<compile_context>
chip_gen: v7x
topology: tpu7x:2x2x1
jax: 0.10.0
libtpu: 0.0.40
codegen_flags: <defaults>
</compile_context>

<pallas_src>
import jax
import jax.numpy as jnp
import numpy as np
from jax.experimental import pallas as pl
from jax.experimental.pallas import tpu as pltpu

EPS = 1e-5            # nn.LayerNorm default
_ROW_BLOCK = 256      # target rows per grid step for row-blocked kernels
_FF_BLOCK = 512       # target FF-chunk width for the head reduction
_T_BLOCK = 64         # target time-chunk for the recurrence

# bf16 gates halve the gate HBM traffic / VMEM residency (MXU takes bf16 on all
# gens); kept f32 here to hold the strict reference tolerance at toy shapes.
GATE_DTYPE = jnp.float32

_PARALLEL = pltpu.CompilerParams(dimension_semantics=("parallel",))


# ------------------------------ helpers ---------------------------------------
def _round_up(x, m):
    return ((x + m - 1) // m) * m


def _row_block(m, target=_ROW_BLOCK):
    return min(target, _round_up(m, 8))


def _pick_div_block(n, target):
    """Largest divisor of n that is <= target."""
    b = min(n, target)
    while n % b != 0:
        b -= 1
    return b


# --------- fused downsample + GRU layer-0 input projection (blocked) ----------
#   xd = x @ w_ds + b_ds
#   gf = xd @ Wi_f + bi_f ;  gb = xd @ Wi_b + bi_b     (two lane-dense outputs)
def _ds_proj_kernel(x_ref, wds_ref, bds_ref, wif_ref, bif_ref, wib_ref, bib_ref,
                    gf_ref, gb_ref):
    xd = (jnp.dot(x_ref[...].astype(jnp.float32), wds_ref[...],
                  preferred_element_type=jnp.float32) + bds_ref[...])
    gf_ref[...] = (jnp.dot(xd, wif_ref[...], preferred_element_type=jnp.float32)
                   + bif_ref[...]).astype(gf_ref.dtype)
    gb_ref[...] = (jnp.dot(xd, wib_ref[...], preferred_element_type=jnp.float32)
                   + bib_ref[...]).astype(gb_ref.dtype)


def ds_proj(x, w_ds, b_ds, wi_f, bi_f, wi_b, bi_b, gate_dtype=GATE_DTYPE):
    M, D = x.shape
    H = w_ds.shape[1]
    G = wi_f.shape[1]                       # 3H
    bm = _row_block(M)
    return pl.pallas_call(
        _ds_proj_kernel,
        out_shape=(jax.ShapeDtypeStruct((M, G), gate_dtype),
                   jax.ShapeDtypeStruct((M, G), gate_dtype)),
        grid=(pl.cdiv(M, bm),),
        in_specs=[
            pl.BlockSpec((bm, D), lambda i: (i, 0)),
            pl.BlockSpec((D, H), lambda i: (0, 0)),
            pl.BlockSpec((1, H), lambda i: (0, 0)),
            pl.BlockSpec((H, G), lambda i: (0, 0)),
            pl.BlockSpec((1, G), lambda i: (0, 0)),
            pl.BlockSpec((H, G), lambda i: (0, 0)),
            pl.BlockSpec((1, G), lambda i: (0, 0)),
        ],
        out_specs=(pl.BlockSpec((bm, G), lambda i: (i, 0)),
                   pl.BlockSpec((bm, G), lambda i: (i, 0))),
        compiler_params=_PARALLEL,
    )(x, w_ds, b_ds, wi_f, bi_f, wi_b, bi_b)


# ------------------ GRU layer-1 input projection (blocked) ---------------------
# Layer-1 input is concat([hf, hb], -1); instead of concatenating we row-split
# the weights: gf = hf @ Wff + hb @ Wfb + bi_f ;  gb = hf @ Wbf + hb @ Wbb + bi_b
def _proj2_kernel(hf_ref, hb_ref, wff_ref, wfb_ref, wbf_ref, wbb_ref,
                  bif_ref, bib_ref, gf_ref, gb_ref):
    hf = hf_ref[...].astype(jnp.float32)
    hb = hb_ref[...].astype(jnp.float32)
    gf_ref[...] = (jnp.dot(hf, wff_ref[...], preferred_element_type=jnp.float32)
                   + jnp.dot(hb, wfb_ref[...], preferred_element_type=jnp.float32)
                   + bif_ref[...]).astype(gf_ref.dtype)
    gb_ref[...] = (jnp.dot(hf, wbf_ref[...], preferred_element_type=jnp.float32)
                   + jnp.dot(hb, wbb_ref[...], preferred_element_type=jnp.float32)
                   + bib_ref[...]).astype(gb_ref.dtype)


def proj2(hf, hb, wff, wfb, wbf, wbb, bi_f, bi_b, gate_dtype=GATE_DTYPE):
    M, H = hf.shape
    G = wff.shape[1]                        # 3H
    bm = _row_block(M)
    w_spec = pl.BlockSpec((H, G), lambda i: (0, 0))
    b_spec = pl.BlockSpec((1, G), lambda i: (0, 0))
    row_spec = pl.BlockSpec((bm, H), lambda i: (i, 0))
    return pl.pallas_call(
        _proj2_kernel,
        out_shape=(jax.ShapeDtypeStruct((M, G), gate_dtype),
                   jax.ShapeDtypeStruct((M, G), gate_dtype)),
        grid=(pl.cdiv(M, bm),),
        in_specs=[row_spec, row_spec, w_spec, w_spec, w_spec, w_spec,
                  b_spec, b_spec],
        out_specs=(pl.BlockSpec((bm, G), lambda i: (i, 0)),
                   pl.BlockSpec((bm, G), lambda i: (i, 0))),
        compiler_params=_PARALLEL,
    )(hf, hb, wff, wfb, wbf, wbb, bi_f, bi_b)


# --------------------- fused bidirectional GRU recurrence ----------------------
# T-blocked: grid over T-chunks ("arbitrary"), hf/hb carried in persistent VMEM
# scratch.  Forward blocks stream 0..N-1; backward blocks stream N-1..0 via a
# mirrored index_map.  Outputs are written in-loop, two lane-dense halves.
def _bigru_rec_kernel(gf_ref, gb_ref, whf_ref, whb_ref, bhnf_ref, bhnb_ref,
                      of_ref, ob_ref, hf_scr, hb_scr):
    bt, B, G3 = gf_ref.shape
    H = G3 // 3

    @pl.when(pl.program_id(0) == 0)
    def _():
        hf_scr[...] = jnp.zeros_like(hf_scr)
        hb_scr[...] = jnp.zeros_like(hb_scr)

    # hoist weights / biases out of the recurrence loop (read once per step)
    wh_f = whf_ref[...].astype(jnp.float32)
    wh_b = whb_ref[...].astype(jnp.float32)
    bhn_f = bhnf_ref[...].astype(jnp.float32)
    bhn_b = bhnb_ref[...].astype(jnp.float32)

    def cell(gx, h, wh, bhn):
        hg = jnp.dot(h, wh, preferred_element_type=jnp.float32)   # (B, 3H)
        r = jax.nn.sigmoid(gx[:, 0 * H:1 * H] + hg[:, 0 * H:1 * H])
        z = jax.nn.sigmoid(gx[:, 1 * H:2 * H] + hg[:, 1 * H:2 * H])
        n = jnp.tanh(gx[:, 2 * H:3 * H] + r * (hg[:, 2 * H:3 * H] + bhn))
        return (1.0 - z) * n + z * h

    def step(t, carry):
        hf, hb = carry
        tb = bt - 1 - t
        hf = cell(gf_ref[t].astype(jnp.float32), hf, wh_f, bhn_f)
        hb = cell(gb_ref[tb].astype(jnp.float32), hb, wh_b, bhn_b)
        of_ref[t] = hf.astype(of_ref.dtype)
        ob_ref[tb] = hb.astype(ob_ref.dtype)
        return (hf, hb)

    unroll = True if bt <= 16 else 8
    hf_fin, hb_fin = jax.lax.fori_loop(0, bt, step,
                                       (hf_scr[...], hb_scr[...]),
                                       unroll=unroll)
    hf_scr[...] = hf_fin
    hb_scr[...] = hb_fin


def bigru_rec(gf, gb, wh_f, wh_b, bhn_f, bhn_b, t_block=_T_BLOCK):
    """gf/gb: (T, B, 3H) precomputed input gates -> (hf, hb), each (T, B, H)."""
    T, B, G3 = gf.shape
    H = G3 // 3
    bt = _pick_div_block(T, t_block)
    n = T // bt
    w_spec = pl.BlockSpec((H, G3), lambda i: (0, 0))
    b_spec = pl.BlockSpec((1, H), lambda i: (0, 0))
    return pl.pallas_call(
        _bigru_rec_kernel,
        out_shape=(jax.ShapeDtypeStruct((T, B, H), gf.dtype),
                   jax.ShapeDtypeStruct((T, B, H), gf.dtype)),
        grid=(n,),
        in_specs=[
            pl.BlockSpec((bt, B, G3), lambda i: (i, 0, 0)),           # fwd gates
            pl.BlockSpec((bt, B, G3), lambda i: (n - 1 - i, 0, 0)),   # bwd gates
            w_spec, w_spec, b_spec, b_spec,
        ],
        out_specs=(pl.BlockSpec((bt, B, H), lambda i: (i, 0, 0)),
                   pl.BlockSpec((bt, B, H), lambda i: (n - 1 - i, 0, 0))),
        scratch_shapes=[pltpu.VMEM((B, H), jnp.float32),   # hf carry
                        pltpu.VMEM((B, H), jnp.float32)],  # hb carry
        compiler_params=pltpu.CompilerParams(
            dimension_semantics=("arbitrary",)),
    )(gf, gb, wh_f, wh_b, bhn_f, bhn_b)


# --------------- Fused head: LN1 -> Linear1+ReLU -> Linear2 -> +res -> LN2 ----
# Grid: (row blocks "parallel", FF chunks "arbitrary").  w1/w2 are streamed in
# FF chunks and accumulated in VMEM scratch (never fully resident).
def _head_kernel(hf_ref, hb_ref, res_ref, g1f, bt1f, g1b, bt1b,
                 w1f_ref, w1b_ref, bw1_ref, w2_ref, bw2, g2, bt2,
                 o_ref, ynf_scr, ynb_scr, acc_scr):
    c = pl.program_id(1)

    @pl.when(c == 0)
    def _():
        hf = hf_ref[...].astype(jnp.float32)
        hb = hb_ref[...].astype(jnp.float32)
        feat = hf.shape[-1] + hb.shape[-1]
        mu = (jnp.sum(hf, -1, keepdims=True)
              + jnp.sum(hb, -1, keepdims=True)) / feat
        var = (jnp.sum(jnp.square(hf - mu), -1, keepdims=True)
               + jnp.sum(jnp.square(hb - mu), -1, keepdims=True)) / feat
        rstd = jax.lax.rsqrt(var + EPS)
        ynf_scr[...] = (hf - mu) * rstd * g1f[...] + bt1f[...]
        ynb_scr[...] = (hb - mu) * rstd * g1b[...] + bt1b[...]
        acc_scr[...] = jnp.zeros_like(acc_scr)

    h = (jnp.dot(ynf_scr[...], w1f_ref[...], preferred_element_type=jnp.float32)
         + jnp.dot(ynb_scr[...], w1b_ref[...], preferred_element_type=jnp.float32)
         + bw1_ref[...])
    h = jnp.maximum(h, 0.0)
    acc_scr[...] += jnp.dot(h, w2_ref[...], preferred_element_type=jnp.float32)

    @pl.when(c == pl.num_programs(1) - 1)
    def _():
        o = acc_scr[...] + bw2[...] + res_ref[...].astype(jnp.float32)
        mu2 = jnp.mean(o, axis=-1, keepdims=True)
        var2 = jnp.mean(jnp.square(o - mu2), axis=-1, keepdims=True)
        o_ref[...] = ((o - mu2) * jax.lax.rsqrt(var2 + EPS) * g2[...]
                      + bt2[...]).astype(o_ref.dtype)


def head(hf, hb, res, fp):
    M, H = hf.shape
    D = res.shape[1]
    FF = fp["w1_f"].shape[1]
    bm = _row_block(M)
    ffb = FF
    for cand in (_FF_BLOCK, 256, 128):
        if FF > cand and FF % cand == 0:
            ffb = cand
            break
    nr, nc = pl.cdiv(M, bm), FF // ffb

    row_h = pl.BlockSpec((bm, H), lambda r, c: (r, 0))
    row_d = pl.BlockSpec((bm, D), lambda r, c: (r, 0))
    vec_h = pl.BlockSpec((1, H), lambda r, c: (0, 0))
    vec_d = pl.BlockSpec((1, D), lambda r, c: (0, 0))

    return pl.pallas_call(
        _head_kernel,
        out_shape=jax.ShapeDtypeStruct((M, D), res.dtype),
        grid=(nr, nc),
        in_specs=[
            row_h, row_h, row_d,
            vec_h, vec_h, vec_h, vec_h,
            pl.BlockSpec((H, ffb), lambda r, c: (0, c)),    # w1 rows for hf
            pl.BlockSpec((H, ffb), lambda r, c: (0, c)),    # w1 rows for hb
            pl.BlockSpec((1, ffb), lambda r, c: (0, c)),    # bw1 chunk
            pl.BlockSpec((ffb, D), lambda r, c: (c, 0)),    # w2 chunk
            vec_d, vec_d, vec_d,
        ],
        out_specs=pl.BlockSpec((bm, D), lambda r, c: (r, 0)),
        scratch_shapes=[pltpu.VMEM((bm, H), jnp.float32),
                        pltpu.VMEM((bm, H), jnp.float32),
                        pltpu.VMEM((bm, D), jnp.float32)],
        compiler_params=pltpu.CompilerParams(
            dimension_semantics=("parallel", "arbitrary")),
    )(hf, hb, res, fp["g1_f"], fp["bt1_f"], fp["g1_b"], fp["bt1_b"],
      fp["w1_f"], fp["w1_b"], fp["bw1"], fp["w2"], fp["bw2"],
      fp["g2"], fp["bt2"])


# ------------------------------ Full forward ----------------------------------
def residual_lstm_forward(x, fp, gate_dtype=GATE_DTYPE):
    T, B, D = x.shape
    M = T * B
    H = fp["wh0_f"].shape[0]
    res2d = x.reshape(M, D)

    # fused downsample + layer-0 input projection (all T at once)
    g0f, g0b = ds_proj(res2d, fp["w_ds"], fp["b_ds"],
                       fp["wi0_f"], fp["bi0_f"], fp["wi0_b"], fp["bi0_b"],
                       gate_dtype)
    hf0, hb0 = bigru_rec(g0f.reshape(T, B, 3 * H), g0b.reshape(T, B, 3 * H),
                         fp["wh0_f"], fp["wh0_b"], fp["bhn0_f"], fp["bhn0_b"])

    # layer-1 input projection (all T at once) + recurrence
    g1f, g1b = proj2(hf0.reshape(M, H), hb0.reshape(M, H),
                     fp["wi1_ff"], fp["wi1_fb"], fp["wi1_bf"], fp["wi1_bb"],
                     fp["bi1_f"], fp["bi1_b"], gate_dtype)
    hf1, hb1 = bigru_rec(g1f.reshape(T, B, 3 * H), g1b.reshape(T, B, 3 * H),
                         fp["wh1_f"], fp["wh1_b"], fp["bhn1_f"], fp["bhn1_b"])

    # norm1 -> linear1+relu -> linear2 -> +res -> norm2 (fused, FF-tiled)
    out = head(hf1.reshape(M, H), hb1.reshape(M, H), res2d, fp)
    return out.reshape(T, B, D)


# ------------------------------ Pure-JAX reference ----------------------------
def _gru_dir_ref(x, p):
    H = p["whr"].shape[0]

    def step(h, x_t):
        r = jax.nn.sigmoid(x_t @ p["wir"] + h @ p["whr"] + p["br"])
        z = jax.nn.sigmoid(x_t @ p["wiz"] + h @ p["whz"] + p["bz"])
        n = jnp.tanh(x_t @ p["win"] + p["bin"] + r * (h @ p["whn"] + p["bhn"]))
        h_new = (1.0 - z) * n + z * h
        return h_new, h_new

    h0 = jnp.zeros((x.shape[1], H), jnp.float32)
    _, ys = jax.lax.scan(step, h0, x)
    return ys


def _layernorm_ref(x, g, b):
    mu = jnp.mean(x, axis=-1, keepdims=True)
    var = jnp.mean(jnp.square(x - mu), axis=-1, keepdims=True)
    return (x - mu) * jax.lax.rsqrt(var + EPS) * g + b


def residual_lstm_ref(x, p):
    res = x
    xd = x @ p["w_ds"] + p["b_ds"]

    def bid(xin, pf, pb):
        f = _gru_dir_ref(xin, pf)
        b = jnp.flip(_gru_dir_ref(jnp.flip(xin, axis=0), pb), axis=0)
        return jnp.concatenate([f, b], axis=-1)

    h0 = bid(xd, p["gru0_f"], p["gru0_b"])
    h1 = bid(h0, p["gru1_f"], p["gru1_b"])
    y = _layernorm_ref(h1, p["g1"], p["bt1"])
    y = jnp.maximum(y @ p["w1"] + p["bw1"], 0.0)
    y = y @ p["w2"] + p["bw2"]
    y = res + y
    return _layernorm_ref(y, p["g2"], p["bt2"])


# ------------------------------ Parameter setup --------------------------------
def make_gru_dir_params(key, h_in, h):
    ks = jax.random.split(key, 10)
    s = 0.2
    return {
        "wir": jax.random.normal(ks[0], (h_in, h), jnp.float32) * s,
        "wiz": jax.random.normal(ks[1], (h_in, h), jnp.float32) * s,
        "win": jax.random.normal(ks[2], (h_in, h), jnp.float32) * s,
        "whr": jax.random.normal(ks[3], (h, h), jnp.float32) * s,
        "whz": jax.random.normal(ks[4], (h, h), jnp.float32) * s,
        "whn": jax.random.normal(ks[5], (h, h), jnp.float32) * s,
        "br":  jax.random.normal(ks[6], (1, h), jnp.float32) * s,  # b_ir + b_hr
        "bz":  jax.random.normal(ks[7], (1, h), jnp.float32) * s,  # b_iz + b_hz
        "bin": jax.random.normal(ks[8], (1, h), jnp.float32) * s,
        "bhn": jax.random.normal(ks[9], (1, h), jnp.float32) * s,
    }


def make_params(key, d_model):
    H = d_model // 4
    ks = jax.random.split(key, 16)
    s = 0.2
    return {
        "w_ds": jax.random.normal(ks[0], (d_model, H), jnp.float32) * s,
        "b_ds": jax.random.normal(ks[1], (1, H), jnp.float32) * s,
        "gru0_f": make_gru_dir_params(ks[2], H, H),
        "gru0_b": make_gru_dir_params(ks[3], H, H),
        "gru1_f": make_gru_dir_params(ks[4], 2 * H, H),
        "gru1_b": make_gru_dir_params(ks[5], 2 * H, H),
        "g1":  jnp.ones((1, 2 * H), jnp.float32),
        "bt1": jnp.zeros((1, 2 * H), jnp.float32),
        "w1":  jax.random.normal(ks[6], (2 * H, 4 * d_model), jnp.float32) * s,
        "bw1": jax.random.normal(ks[7], (1, 4 * d_model), jnp.float32) * s,
        "w2":  jax.random.normal(ks[8], (4 * d_model, d_model), jnp.float32) * s,
        "bw2": jax.random.normal(ks[9], (1, d_model), jnp.float32) * s,
        "g2":  jnp.ones((1, d_model), jnp.float32),
        "bt2": jnp.zeros((1, d_model), jnp.float32),
    }


def _fuse_gru_dir(p):
    wi = jnp.concatenate([p["wir"], p["wiz"], p["win"]], axis=1)   # (H_in, 3H)
    bi = jnp.concatenate([p["br"], p["bz"], p["bin"]], axis=1)     # (1, 3H)
    wh = jnp.concatenate([p["whr"], p["whz"], p["whn"]], axis=1)   # (H, 3H)
    return wi, bi, wh, p["bhn"]


def fuse_params(p):
    """One-time fusion of per-gate weights into MXU-friendly, lane-dense slabs."""
    H = p["w_ds"].shape[1]
    wi0f, bi0f, wh0f, bhn0f = _fuse_gru_dir(p["gru0_f"])
    wi0b, bi0b, wh0b, bhn0b = _fuse_gru_dir(p["gru0_b"])
    wi1f, bi1f, wh1f, bhn1f = _fuse_gru_dir(p["gru1_f"])   # (2H, 3H)
    wi1b, bi1b, wh1b, bhn1b = _fuse_gru_dir(p["gru1_b"])   # (2H, 3H)
    return {
        "w_ds": p["w_ds"], "b_ds": p["b_ds"],
        # layer 0 (input is xd, H features)
        "wi0_f": wi0f, "bi0_f": bi0f, "wi0_b": wi0b, "bi0_b": bi0b,
        "wh0_f": wh0f, "wh0_b": wh0b, "bhn0_f": bhn0f, "bhn0_b": bhn0b,
        # layer 1 (input is [hf | hb]); weights row-split so no concat needed
        "wi1_ff": wi1f[:H], "wi1_fb": wi1f[H:], "bi1_f": bi1f,
        "wi1_bf": wi1b[:H], "wi1_bb": wi1b[H:], "bi1_b": bi1b,
        "wh1_f": wh1f, "wh1_b": wh1b, "bhn1_f": bhn1f, "bhn1_b": bhn1b,
        # head (LN1 params / w1 row-split to match (hf, hb) inputs)
        "g1_f": p["g1"][:, :H], "g1_b": p["g1"][:, H:],
        "bt1_f": p["bt1"][:, :H], "bt1_b": p["bt1"][:, H:],
        "w1_f": p["w1"][:H], "w1_b": p["w1"][H:], "bw1": p["bw1"],
        "w2": p["w2"], "bw2": p["bw2"],
        "g2": p["g2"], "bt2": p["bt2"],
    }


if __name__ == "__main__":
    D_MODEL = 32    # -> hidden H = 8, GRU output 16, FFN 128
    SEQ, BATCH = 8, 2

    key = jax.random.PRNGKey(0)
    kx, kp = jax.random.split(key)
    x = jax.random.normal(kx, (SEQ, BATCH, D_MODEL), jnp.float32)
    params = make_params(kp, D_MODEL)
    fparams = jax.tree_util.tree_map(jax.block_until_ready, fuse_params(params))

    out = residual_lstm_forward(x, fparams)
    out = jax.block_until_ready(out)

    ref = jax.block_until_ready(residual_lstm_ref(x, params))
    np.testing.assert_allclose(np.asarray(out), np.asarray(ref),
                               rtol=2e-3, atol=2e-3)
    print("KERNEL_OK")
</pallas_src>

<mosaic_0001>
module attributes {stable_mosaic.version = 11 : i64} {
  func.func @_ds_proj_kernel(%arg0: i32, %arg1: memref<16x32xf32, #tpu.memory_space<vmem>>, %arg2: memref<32x8xf32, #tpu.memory_space<vmem>>, %arg3: memref<1x8xf32, #tpu.memory_space<vmem>>, %arg4: memref<8x24xf32, #tpu.memory_space<vmem>>, %arg5: memref<1x24xf32, #tpu.memory_space<vmem>>, %arg6: memref<8x24xf32, #tpu.memory_space<vmem>>, %arg7: memref<1x24xf32, #tpu.memory_space<vmem>>, %arg8: memref<16x24xf32, #tpu.memory_space<vmem>>, %arg9: memref<16x24xf32, #tpu.memory_space<vmem>>) attributes {dimension_semantics = [#tpu.dimension_semantics<parallel>], iteration_bounds = array<i64: 1>, scalar_prefetch = 0 : i64, scratch_operands = 0 : i64, tpu.core_type = #tpu.core_type<tc>, window_params = [{transform_indices = @transform_0, window_bounds = array<i64: 16, 32>}, {pipeline_mode = #tpu.pipeline_mode<synchronous>, transform_indices = @transform_1, window_bounds = array<i64: 32, 8>}, {pipeline_mode = #tpu.pipeline_mode<synchronous>, transform_indices = @transform_2, window_bounds = array<i64: 1, 8>}, {pipeline_mode = #tpu.pipeline_mode<synchronous>, transform_indices = @transform_3, window_bounds = array<i64: 8, 24>}, {pipeline_mode = #tpu.pipeline_mode<synchronous>, transform_indices = @transform_4, window_bounds = array<i64: 1, 24>}, {pipeline_mode = #tpu.pipeline_mode<synchronous>, transform_indices = @transform_5, window_bounds = array<i64: 8, 24>}, {pipeline_mode = #tpu.pipeline_mode<synchronous>, transform_indices = @transform_6, window_bounds = array<i64: 1, 24>}, {transform_indices = @transform_7, window_bounds = array<i64: 16, 24>}, {transform_indices = @transform_8, window_bounds = array<i64: 16, 24>}]} {
    %c0 = arith.constant 0 : index
    %c0_0 = arith.constant 0 : index
    %0 = vector.load %arg1[%c0, %c0_0] : memref<16x32xf32, #tpu.memory_space<vmem>>, vector<16x32xf32>
    %c0_1 = arith.constant 0 : index
    %c0_2 = arith.constant 0 : index
    %1 = vector.load %arg2[%c0_1, %c0_2] : memref<32x8xf32, #tpu.memory_space<vmem>>, vector<32x8xf32>
    %cst = arith.constant dense<0.000000e+00> : vector<16x8xf32>
    %2 = tpu.matmul %0, %1, %cst {dimension_numbers = #tpu.dot_dimension_numbers<[1], [0], [0], [1], [0, 0, 1, 1], [], []>} : vector<16x32xf32>, vector<32x8xf32>, vector<16x8xf32> -> vector<16x8xf32>
    %c0_3 = arith.constant 0 : index
    %c0_4 = arith.constant 0 : index
    %3 = vector.load %arg3[%c0_3, %c0_4] : memref<1x8xf32, #tpu.memory_space<vmem>>, vector<1x8xf32>
    %4 = vector.broadcast %3 : vector<1x8xf32> to vector<16x8xf32>
    %5 = arith.addf %2, %4 : vector<16x8xf32>
    %c0_5 = arith.constant 0 : index
    %c0_6 = arith.constant 0 : index
    %6 = vector.load %arg4[%c0_5, %c0_6] : memref<8x24xf32, #tpu.memory_space<vmem>>, vector<8x24xf32>
    %cst_7 = arith.constant dense<0.000000e+00> : vector<16x24xf32>
    %7 = tpu.matmul %5, %6, %cst_7 {dimension_numbers = #tpu.dot_dimension_numbers<[1], [0], [0], [1], [0, 0, 1, 1], [], []>} : vector<16x8xf32>, vector<8x24xf32>, vector<16x24xf32> -> vector<16x24xf32>
    %c0_8 = arith.constant 0 : index
    %c0_9 = arith.constant 0 : index
    %8 = vector.load %arg5[%c0_8, %c0_9] : memref<1x24xf32, #tpu.memory_space<vmem>>, vector<1x24xf32>
    %9 = vector.broadcast %8 : vector<1x24xf32> to vector<16x24xf32>
    %10 = arith.addf %7, %9 : vector<16x24xf32>
    %c0_10 = arith.constant 0 : index
    %c0_11 = arith.constant 0 : index
    %11 = vector.load %arg8[%c0_10, %c0_11] : memref<16x24xf32, #tpu.memory_space<vmem>>, vector<16x24xf32>
    tpu.vector_store %arg8[%c0_10, %c0_11], %10 {strides = array<i32>} : memref<16x24xf32, #tpu.memory_space<vmem>>, vector<16x24xf32>,
    %c0_12 = arith.constant 0 : index
    %c0_13 = arith.constant 0 : index
    %12 = vector.load %arg6[%c0_12, %c0_13] : memref<8x24xf32, #tpu.memory_space<vmem>>, vector<8x24xf32>
    %cst_14 = arith.constant dense<0.000000e+00> : vector<16x24xf32>
    %13 = tpu.matmul %5, %12, %cst_14 {dimension_numbers = #tpu.dot_dimension_numbers<[1], [0], [0], [1], [0, 0, 1, 1], [], []>} : vector<16x8xf32>, vector<8x24xf32>, vector<16x24xf32> -> vector<16x24xf32>
    %c0_15 = arith.constant 0 : index
    %c0_16 = arith.constant 0 : index
    %14 = vector.load %arg7[%c0_15, %c0_16] : memref<1x24xf32, #tpu.memory_space<vmem>>, vector<1x24xf32>
    %15 = vector.broadcast %14 : vector<1x24xf32> to vector<16x24xf32>
    %16 = arith.addf %13, %15 : vector<16x24xf32>
    %c0_17 = arith.constant 0 : index
    %c0_18 = arith.constant 0 : index
    %17 = vector.load %arg9[%c0_17, %c0_18] : memref<16x24xf32, #tpu.memory_space<vmem>>, vector<16x24xf32>
    tpu.vector_store %arg9[%c0_17, %c0_18], %16 {strides = array<i32>} : memref<16x24xf32, #tpu.memory_space<vmem>>, vector<16x24xf32>,
    return
  }
  func.func @transform_0(%arg0: i32) -> (i32, i32) {
    %c0_i32 = arith.constant 0 : i32
    %c0_i32_0 = arith.constant 0 : i32
    return %arg0, %c0_i32 : i32, i32
  }
  func.func @transform_1(%arg0: i32) -> (i32, i32) {
    %c0_i32 = arith.constant 0 : i32
    %c0_i32_0 = arith.constant 0 : i32
    %c0_i32_1 = arith.constant 0 : i32
    return %c0_i32, %c0_i32_0 : i32, i32
  }
  func.func @transform_2(%arg0: i32) -> (i32, i32) {
    %c0_i32 = arith.constant 0 : i32
    %c0_i32_0 = arith.constant 0 : i32
    %c0_i32_1 = arith.constant 0 : i32
    return %c0_i32, %c0_i32_0 : i32, i32
  }
  func.func @transform_3(%arg0: i32) -> (i32, i32) {
    %c0_i32 = arith.constant 0 : i32
    %c0_i32_0 = arith.constant 0 : i32
    %c0_i32_1 = arith.constant 0 : i32
    return %c0_i32, %c0_i32_0 : i32, i32
  }
  func.func @transform_4(%arg0: i32) -> (i32, i32) {
    %c0_i32 = arith.constant 0 : i32
    %c0_i32_0 = arith.constant 0 : i32
    %c0_i32_1 = arith.constant 0 : i32
    return %c0_i32, %c0_i32_0 : i32, i32
  }
  func.func @transform_5(%arg0: i32) -> (i32, i32) {
    %c0_i32 = arith.constant 0 : i32
    %c0_i32_0 = arith.constant 0 : i32
    %c0_i32_1 = arith.constant 0 : i32
    return %c0_i32, %c0_i32_0 : i32, i32
  }
  func.func @transform_6(%arg0: i32) -> (i32, i32) {
    %c0_i32 = arith.constant 0 : i32
    %c0_i32_0 = arith.constant 0 : i32
    %c0_i32_1 = arith.constant 0 : i32
    return %c0_i32, %c0_i32_0 : i32, i32
  }
  func.func @transform_7(%arg0: i32) -> (i32, i32) {
    %c0_i32 = arith.constant 0 : i32
    %c0_i32_0 = arith.constant 0 : i32
    return %arg0, %c0_i32 : i32, i32
  }
  func.func @transform_8(%arg0: i32) -> (i32, i32) {
    %c0_i32 = arith.constant 0 : i32
    %c0_i32_0 = arith.constant 0 : i32
    return %arg0, %c0_i32 : i32, i32
  }
}

</mosaic_0001>

<bundles_post_ra>
// kernel: tpu_custom_call.1
= control target key start
LH: loop header
LB: loop body
LE: loop exit
PB: predicated region body
PF: predicated region fallthrough
CT: control target
= control target key end

     0   :  { %14 = vsyncpa [#allocation3], 0  ;;  %vm43_vm0 = vcmask 261120   ;;  %s547_s0 = inlined_call_operand.vmem [shape: f32[16,32], index: 0, kind: input, shape index: {}]   ;;  %s548_s1 = inlined_call_operand.vmem [shape: f32[32,8], index: 1, kind: input, shape index: {}]   ;;  %s549_s2 = inlined_call_operand.vmem [shape: f32[1,8], index: 2, kind: input, shape index: {}]   ;;  %s550_s3 = inlined_call_operand.vmem [shape: f32[8,24], index: 3, kind: input, shape index: {}]   ;;  %s551_s4 = inlined_call_operand.vmem [shape: f32[1,24], index: 4, kind: input, shape index: {}]   ;;  %s552_s5 = inlined_call_operand.vmem [shape: f32[8,24], index: 5, kind: input, shape index: {}]   ;;  %s553_s6 = inlined_call_operand.vmem [shape: f32[1,24], index: 6, kind: input, shape index: {}]   ;;  %s554_s7 = inlined_call_operand.hbm [shape: f32[16,24], index: 7, kind: output, shape index: {0}]   ;;  %s555_s8 = inlined_call_operand.hbm [shape: f32[16,24], index: 8, kind: output, shape index: {1}]  }
   0x1   :  { %v32_v0 = vld [vmem:[%s548_s1] sm:$0xff]  ;;  %v33_v1 = vld [vmem:[%s548_s1 + $0x8] sm:$0xff]  ;;  %v34_v2 = vld [vmem:[%s548_s1 + $0x10] sm:$0xff] }
   0x2   :  { %v377_v3 = vpack.c.bf16 %v33_v1, %v32_v0  ;;  %v35_v4 = vld [vmem:[%s548_s1 + $0x18] sm:$0xff]  ;;  %v30_v5 = vld [vmem:[%s547_s0] sm:$0xff] }
   0x3   :  { %v381_v6 = vpack.c.bf16 %v35_v4, %v34_v2  ;;  %364 = vmatprep.mubr.msk.f32.mxu0 %vm43_vm0, %v30_v5 }
   0x4   :  { %15 = vsyncpa [#allocation5], 0  ;;  %378 = vmatprep.subr.bf16.mxu0 %v377_v3  ;;  %v31_v7 = vld [vmem:[%s547_s0 + $0x8] sm:$0xff]  ;;  %v125_v8 = vld [vmem:[%s550_s3] sm:$0xff]  ;;  %vm133_vm1 = vcmask 64512   ;;  %vm215_vm2 = vcmask 195584  }
   0x5   :  { %380 = vmatpush3.bf16.msra.mxu0 %v377_v3  ;;  %367 = vmatprep.subr.mxu1 %v125_v8  ;;  %v218_v9 = vld [vmem:[%s552_s5] sm:$0xff]  ;;  %s437_s5 = smov [#allocation2]   ;;  %s438_s24 = smov [#allocation4]  }
   0x6   :  { %382 = vmatprep.subr.bf16.mxu0 %v381_v6  ;;  %368 = vmatpush3.msra.mxu1 %v125_v8  ;;  %v335_v10 = vld [vmem:[%s549_s2] ss:$0 sm:$0xff]  ;;  %s308_s22 = sshll.u32 %s437_s5, 4  ;;  %s320_s25 = sshll.u32 %s438_s24, 4  ;;  %s309_s22 = int_to_ptr.vmem [resolvable:$true] %s308_s22  ;;  %s321_s25 = int_to_ptr.vmem [resolvable:$true] %s320_s25 }
   0x7   :  { %372 = vmatprep.subr.mxu1 %v218_v9  ;;  %v338_v15 = vld [vmem:[%s551_s4] ss:$0 sm:$0xff]  ;;  %s389_s4 = scalar_lea.vmem %s309_s22, 256  ;;  %p394_p1 = scmp.lt.s32.totalorder %s309_s22, %s309_s22 }
   0x8   :  { %v341_v20 = vld [vmem:[%s553_s6] ss:$0 sm:$0xff]  ;;  %p390_p0 = scmp.ne.s32.totalorder %s309_s22, %s389_s4  ;;  %p395_p2 = scmp.lt.s32.totalorder %s389_s4, %s389_s4 }
   0x9   :  { %384 = vmatpush3.bf16.msra.mxu0 %v381_v6 }
   0xa   :  { %p396_p3 = por %p395_p2, %p394_p1 }
   0xc   :  { %365 = vmatmul.mubr.msk.f32.vlgmr.msra.gmra.mrb[0].mxu0 %vm43_vm0, %v31_v7  ;;  %p397_p4 = pnand %p396_p3, %p390_p0 }
  0xdf   :  { %v366_v11 = vpop.f32.mrb[0].mxu0 }
  0xe0   :  { %v116_v12 = vpop.f32.mrb[1].mxu0  ;;  %v122_v14 = vadd.f32 %v366_v11, %v335_v10 }
  0xe1   :  { %v117_v13 = vadd.f32 %v335_v10, %v116_v12 }
  0xe3   :  { %369 = vmatprep.mubr.msk.f32.mxu1 %vm133_vm1, %v117_v13 }
  0xe4   :  { %370 = vmatmul.mubr.msk.f32.vlgmr.msra.gmra.mrb[0].mxu1 %vm133_vm1, %v122_v14 }
  0xe5   :  { %373 = vmatpush3.msra.mxu1 %v218_v9  ;;  %374 = vmatprep.mubr.msk.f32.mxu1 %vm133_vm1, %v117_v13 }
  0xe8   :  { %375 = vmatmul.mubr.msk.f32.vlgmr.msra.gmra.mrb[2].mxu1 %vm133_vm1, %v122_v14 }
 0x1b7   :  { %v371_v16 = vpop.f32.mrb[0].mxu1 }
 0x1b8   :  { %v212_v17 = vadd.f32 %v371_v16, %v338_v15  ;;  %v206_v18 = vpop.f32.mrb[1].mxu1 }
 0x1b9   :  { %v207_v19 = vadd.f32 %v338_v15, %v206_v18 }
 0x1ba   :  { %217 = vst.msk [vmem:[#allocation2 + $0x8] sm:$0xff] %vm215_vm2, %v212_v17 }
 0x1bb   :  { %216 = vst.msk [vmem:[#allocation2] sm:$0xff] %vm215_vm2, %v207_v19  ;;  %v376_v21 = vpop.f32.mrb[2].mxu1 }
 0x1bc   :  { %v298_v22 = vadd.f32 %v376_v21, %v341_v20  ;;  %v292_v23 = vpop.f32.mrb[3].mxu1 }
 0x1bd   :  { %400 = shalt.err (!%p397_p4)
}
 0x1be   :  { %s401_s6 = scalar_lea.hbm %s554_s7, 256 }
 0x1bf   :  { %p402_p5 = scmp.ne.s32.totalorder %s554_s7, %s401_s6  ;;  %p405_p6 = scmp.lt.u32.totalorder %s401_s6, %s554_s7 }
 0x1c1   :  { %p407_p7 = pnand %p405_p6, %p402_p5 }
 0x1c3   :  { %410 = shalt.err (!%p407_p7)
}
 0x1c4   :  { %s439_s10 = smov 128   ;;  %s440_s11 = smov 8   ;;  %v293_v24 = vadd.f32 %v341_v20, %v292_v23  ;;  %302 = vst.msk [vmem:[#allocation4 + $0x8] sm:$0xff] %vm215_vm2, %v298_v22 }
 0x1c5   :  { %314 = dma.vmem_to_hbm [thread:$0]  %s309_s22, 256, %s554_s7, [#allocation3], %s439_s10, %s439_s10, %s440_s11  }
 0x1c6   :  { %301 = vst.msk [vmem:[#allocation4] sm:$0xff] %vm215_vm2, %v293_v24  ;;  %s411_s14 = scalar_lea.vmem %s321_s25, 256  ;;  %p416_p9 = scmp.lt.s32.totalorder %s321_s25, %s321_s25 }
 0x1c7   :  { %p412_p8 = scmp.ne.s32.totalorder %s321_s25, %s411_s14  ;;  %p417_p10 = scmp.lt.s32.totalorder %s411_s14, %s411_s14 }
 0x1c9   :  { %p418_p11 = por %p417_p10, %p416_p9 }
 0x1cb   :  { %p419_p12 = pnand %p418_p11, %p412_p8 }
 0x1cd   :  { %422 = shalt.err (!%p419_p12)
}
 0x1ce   :  { %s423_s17 = scalar_lea.hbm %s555_s8, 256 }
 0x1cf   :  { %p424_p13 = scmp.ne.s32.totalorder %s555_s8, %s423_s17  ;;  %p427_p0 = scmp.lt.u32.totalorder %s423_s17, %s555_s8 }
 0x1d1   :  { %p429_p1 = pnand %p427_p0, %p424_p13 }
 0x1d3   :  { %432 = shalt.err (!%p429_p1)
}
 0x1d4   :  { %326 = dma.vmem_to_hbm [thread:$0]  %s321_s25, 256, %s555_s8, [#allocation5], %s439_s10, %s439_s10, %s440_s11  }
 0x1d5   :  { %433 = dma.done.wait [#allocation3], 256  }
 0x1d6   :  { %434 = vsyncadd [#allocation3], 4294967040 }
 0x1d7   :  { %435 = dma.done.wait [#allocation5], 256  }
 0x1d8   :  { %436 = vsyncadd [#allocation5], 4294967040 }
 0x1d9   :  { %333 = vsyncpa [#allocation3], 1 }
 0x1da   :  { %334 = vsyncpa [#allocation5], 1 }

</bundles_post_ra>
